<compile_context>
chip_gen: v7x
topology: tpu7x:2x2x1
jax: 0.10.0
libtpu: 0.0.40
codegen_flags: <defaults>
</compile_context>

<pallas_src>
import functools

import numpy as np
import jax
import jax.numpy as jnp
from jax import lax
from jax.experimental import pallas as pl
from jax.experimental.pallas import tpu as pltpu

# Deterministic stand-in for `(random.random() > 0.5) * 2 - 1` in __init__.
SHIFT = 1

# Shapes are hard-coded by the module's reshapes.
N, CIN, H, W, COUT, K = 128, 128, 14, 14, 32, 3
P = H * W                      # 196 flattened spatial positions per image
B_BLK = 32                     # images per grid step -> grid of 4
LANES = B_BLK * P              # 6272 = 49 * 128 lane-dense block width

# HIGHEST keeps the f32 result bit-tight vs. the reference.  For v5e this can
# be lowered to lax.Precision.DEFAULT if looser tolerances are acceptable.
MATMUL_PRECISION = lax.Precision.HIGHEST


@functools.lru_cache(maxsize=None)
def _roll_matches_numpy() -> bool:
    """True iff pltpu.roll(x, s, axis)[i] == x[(i - s) % n] (jnp.roll convention)."""

    def probe(x_ref, o_ref):
        o_ref[...] = pltpu.roll(x_ref[...], 1, axis=1)

    x = jnp.tile(jnp.arange(128, dtype=jnp.float32)[None, :], (8, 1))
    y = pl.pallas_call(probe, out_shape=jax.ShapeDtypeStruct((8, 128), jnp.float32))(x)
    return bool(jnp.array_equal(y, jnp.roll(x, 1, axis=1)))


def _flat_terms(shift: int, numpy_roll: bool):
    """Static decomposition of roll_W(s) -> 3-tap zero-padded conv -> roll_H(s).

    Expressed over the concatenated (B_BLK * P) lane axis as a sum of terms
        coef_t(q) * circular_roll(P_{k(t)}, amount_t)
    where P_k[j, q] = sum_i W[j, k, i] * x_cm[i, q] is the per-tap channel
    contraction, q = b*P + (h*W + w), and coef_t is a 0/1 mask depending only
    on (h, w).  For every masked position the roll's source index stays inside
    the same image's [b*P, (b+1)*P) range, so no data leaks across images.
    """
    p = np.arange(P)
    h, w = p // W, p % W
    terms = []
    for k in range(K):
        d = k - 1                                          # tap offset along W
        valid = (w + d >= 0) & (w + d <= W - 1)            # zero padding along W
        src = ((h - shift) % H) * W + ((w + d - shift) % W)
        delta = p - src                                    # per-position source offset
        for a in np.unique(delta[valid]):
            mask = valid & (delta == a)
            amt = int(a) % LANES if numpy_roll else int(-a) % LANES
            coef = np.tile(mask.astype(np.float32), B_BLK)  # same mask every image
            terms.append((k, amt, coef))
    return terms


def _conv_roll_kernel(term_meta, x_ref, w_ref, c_ref, o_ref):
    # x_ref : (CIN, LANES)     channel-major input block (B_BLK images side by side)
    # w_ref : (K*COUT, CIN)    concatenated per-tap weights
    # c_ref : (n_terms, LANES) 0/1 coefficient rows
    # o_ref : (COUT, LANES)    channel-major output block (lane-dense store)
    p_all = jnp.dot(
        w_ref[...], x_ref[...],
        preferred_element_type=jnp.float32,
        precision=MATMUL_PRECISION,
    )                                                      # (96, 6272) one long-N matmul

    acc = jnp.zeros((COUT, LANES), jnp.float32)
    for t, (k, amt) in enumerate(term_meta):
        p_k = p_all[k * COUT:(k + 1) * COUT, :]            # sublane-aligned slice (0/32/64)
        rolled = pltpu.roll(p_k, amt, axis=1) if amt else p_k   # XLU lane rotate
        acc = acc + c_ref[t][None, :] * rolled
    o_ref[...] = acc.astype(o_ref.dtype)                   # single, unmasked store


def _build_forward(shift: int, numpy_roll: bool):
    terms = _flat_terms(shift, numpy_roll)
    term_meta = tuple((k, amt) for k, amt, _ in terms)
    coefs = jnp.asarray(np.stack([c for _, _, c in terms], axis=0))  # (T, LANES) f32
    n_terms = coefs.shape[0]

    @jax.jit
    def forward(x_nchw, weight):
        # Channel-major layout so each grid step is one lane-dense matmul.
        x_cm = jnp.transpose(x_nchw.reshape(N, CIN, P), (1, 0, 2)).reshape(CIN, N * P)
        # w_cat[k*COUT + j, i] = weight[j, k, i]
        w_cat = jnp.transpose(weight, (1, 0, 2)).reshape(K * COUT, CIN)

        out_cm = pl.pallas_call(
            functools.partial(_conv_roll_kernel, term_meta),
            out_shape=jax.ShapeDtypeStruct((COUT, N * P), x_nchw.dtype),
            grid=(N // B_BLK,),
            in_specs=[
                pl.BlockSpec((CIN, LANES), lambda n: (0, n)),
                pl.BlockSpec((K * COUT, CIN), lambda n: (0, 0)),
                pl.BlockSpec((n_terms, LANES), lambda n: (0, 0)),
            ],
            out_specs=pl.BlockSpec((COUT, LANES), lambda n: (0, n)),
            compiler_params=pltpu.CompilerParams(
                dimension_semantics=("parallel",),
                vmem_limit_bytes=24 * 1024 * 1024,
            ),
        )(x_cm, w_cat, coefs)

        out = jnp.transpose(out_cm.reshape(COUT, N, P), (1, 0, 2))
        return out.reshape(N, COUT, H, W)

    return forward


@functools.lru_cache(maxsize=None)
def _get_forward():
    return _build_forward(SHIFT, _roll_matches_numpy())


def kernel_generated_2_forward(x_nchw, weight):
    """x_nchw: (N, CIN, H, W) f32, weight: (COUT, K, CIN) f32 -> (N, COUT, H, W)."""
    return _get_forward()(x_nchw, weight)


def reference(x, wgt):
    """Pure-JAX reference mirroring the PyTorch forward."""
    x_r = jnp.roll(x, SHIFT, axis=3)
    xp = jnp.pad(x_r, ((0, 0), (0, 0), (0, 0), (1, 1)))
    y = sum(
        jnp.einsum(
            "nihw,ji->njhw",
            xp[:, :, :, k:k + W],
            wgt[:, k, :],
            precision=lax.Precision.HIGHEST,
        )
        for k in range(K)
    )
    return jnp.roll(y, SHIFT, axis=2)


if __name__ == "__main__":
    key = jax.random.PRNGKey(0)
    kx, kw = jax.random.split(key)
    # Shapes are fixed by the module's hard-coded reshapes.
    x = jax.random.normal(kx, (N, CIN, H, W), dtype=jnp.float32)
    wgt = jax.random.normal(kw, (COUT, K, CIN), dtype=jnp.float32)  # torch.randn([32,3,128])

    y = jax.block_until_ready(kernel_generated_2_forward(x, wgt))
    y_ref = jax.block_until_ready(reference(x, wgt))

    assert y.shape == (N, COUT, H, W), y.shape
    err = float(jnp.max(jnp.abs(y - y_ref)))
    assert jnp.allclose(y, y_ref, rtol=1e-3, atol=1e-3), err
    print("KERNEL_OK")
</pallas_src>

<mosaic_0001>
module attributes {stable_mosaic.version = 11 : i64} {
  func.func @probe(%arg0: memref<8x128xf32, #tpu.memory_space<vmem>>, %arg1: memref<8x128xf32, #tpu.memory_space<vmem>>) attributes {dimension_semantics = [], scalar_prefetch = 0 : i64, scratch_operands = 0 : i64, tpu.core_type = #tpu.core_type<tc>} {
    %c0 = arith.constant 0 : index
    %c0_0 = arith.constant 0 : index
    %0 = vector.load %arg0[%c0, %c0_0] : memref<8x128xf32, #tpu.memory_space<vmem>>, vector<8x128xf32>
    %c1_i32 = arith.constant 1 : i32
    %1 = tpu.dynamic_rotate %0 by %c1_i32 dim 1 : vector<8x128xf32>, i32 -> vector<8x128xf32>
    %c0_1 = arith.constant 0 : index
    %c0_2 = arith.constant 0 : index
    %2 = vector.load %arg1[%c0_1, %c0_2] : memref<8x128xf32, #tpu.memory_space<vmem>>, vector<8x128xf32>
    tpu.vector_store %arg1[%c0_1, %c0_2], %1 {strides = array<i32>} : memref<8x128xf32, #tpu.memory_space<vmem>>, vector<8x128xf32>,
    return
  }
}

</mosaic_0001>

<bundles_post_ra>
// kernel: tpu_custom_call.1
= control target key start
LH: loop header
LB: loop body
LE: loop exit
PB: predicated region body
PF: predicated region fallthrough
CT: control target
= control target key end

     0   :  { %6 = vsyncpa [#allocation3], 0  ;;  %s128_s0 = inlined_call_operand.hbm [shape: f32[8,128], index: 0, kind: input, shape index: {}]   ;;  %s129_s1 = inlined_call_operand.hbm [shape: f32[8,128], index: 1, kind: output, shape index: {}]  }
   0x1   :  { %7 = vsyncpa [#allocation4], 0  ;;  %s91_s6 = smov [#allocation2]   ;;  %s43_s10 = scalar_lea.hbm %s128_s0, 128 }
   0x2   :  { %s14_s7 = sshll.u32 %s91_s6, 4  ;;  %p44_p0 = scmp.ne.s32.totalorder %s128_s0, %s43_s10  ;;  %s15_s7 = int_to_ptr.vmem [resolvable:$true] %s14_s7 }
   0x3   :  { %p47_p1 = scmp.lt.u32.totalorder %s43_s10, %s128_s0 }
   0x5   :  { %p49_p2 = pnand %p47_p1, %p44_p0 }
   0x7   :  { %52 = shalt.err (!%p49_p2)
}
   0x8   :  { %s53_s15 = scalar_lea.vmem %s15_s7, 128  ;;  %p58_p4 = scmp.lt.s32.totalorder %s15_s7, %s15_s7 }
   0x9   :  { %p54_p3 = scmp.ne.s32.totalorder %s15_s7, %s53_s15  ;;  %p59_p5 = scmp.lt.s32.totalorder %s53_s15, %s53_s15 }
   0xb   :  { %p60_p6 = por %p59_p5, %p58_p4 }
   0xd   :  { %p61_p7 = pnand %p60_p6, %p54_p3 }
   0xf   :  { %64 = shalt.err (!%p61_p7)
}
  0x10   :  { %17 = dma.hbm_to_vmem [thread:$0]  %s128_s0, 128, %s15_s7, [#allocation3]  }
  0x11   :  { %87 = dma.done.wait [#allocation3], 128  }
  0x12   :  { %88 = vsyncadd [#allocation3], 4294967168  ;;  %v21_v0 = vld [vmem:[#allocation2] sm:$0xff]  ;;  %s92_s18 = smov 1   ;;  %s93_s19 = smov [#allocation5]  }
  0x13   :  { %22 = vrot.lane.b32.xlu0 %v21_v0, %s92_s18  ;;  %s31_s20 = sshll.u32 %s93_s19, 4  ;;  %s32_s20 = int_to_ptr.vmem [resolvable:$true] %s31_s20 }
  0x14   :  { %s65_s21 = scalar_lea.vmem %s32_s20, 128  ;;  %p70_p9 = scmp.lt.s32.totalorder %s32_s20, %s32_s20 }
  0x15   :  { %p66_p8 = scmp.ne.s32.totalorder %s32_s20, %s65_s21  ;;  %p71_p10 = scmp.lt.s32.totalorder %s65_s21, %s65_s21 }
  0x17   :  { %p72_p11 = por %p71_p10, %p70_p9 }
  0x19   :  { %p73_p12 = pnand %p72_p11, %p66_p8 }
  0x85   :  { %v23_v1 = vpop.permute.xlu0 %22 }
  0x86   :  { %24 = vst [vmem:[#allocation5] sm:$0xff] %v23_v1 }
  0x87   :  { %76 = shalt.err (!%p73_p12)
}
  0x88   :  { %s77_s0 = scalar_lea.hbm %s129_s1, 128 }
  0x89   :  { %p78_p13 = scmp.ne.s32.totalorder %s129_s1, %s77_s0  ;;  %p81_p0 = scmp.lt.u32.totalorder %s77_s0, %s129_s1 }
  0x8b   :  { %p83_p1 = pnand %p81_p0, %p78_p13 }
  0x8d   :  { %86 = shalt.err (!%p83_p1)
}
  0x8e   :  { %34 = dma.vmem_to_hbm [thread:$0]  %s32_s20, 128, %s129_s1, [#allocation4]  }
  0x8f   :  { %89 = dma.done.wait [#allocation4], 128  }
  0x90   :  { %90 = vsyncadd [#allocation4], 4294967168 }
  0x91   :  { %38 = vsyncpa [#allocation3], 1 }
  0x92   :  { %39 = vsyncpa [#allocation4], 1 }

</bundles_post_ra>
